<compile_context>
chip_gen: v7x
topology: tpu7x:2x2x1
jax: 0.10.0
libtpu: 0.0.40
codegen_flags: <defaults>
</compile_context>

<pallas_src>
import math
import functools

import jax
import jax.numpy as jnp
from jax import lax
from jax.experimental import pallas as pl
from jax.experimental.pallas import tpu as pltpu


# ----------------------------- helpers -----------------------------

def _pick_tile(dim, desired, base):
    """Largest tile <= desired that divides `dim` and is a multiple of `base`,
    falling back to the full dimension (full-extent blocks are always legal)."""
    if dim <= desired:
        return dim
    t = max(base, (desired // base) * base)
    while t >= base:
        if dim % t == 0:
            return t
        t -= base
    return dim


# ----------------------------- Conv1D (x @ W + b) -----------------------------

def _linear_kernel(x_ref, w_ref, b_ref, o_ref, acc_ref):
    k_idx = pl.program_id(2)

    @pl.when(k_idx == 0)
    def _():
        acc_ref[...] = jnp.zeros(acc_ref.shape, jnp.float32)

    acc_ref[...] += jnp.dot(x_ref[...], w_ref[...],
                            preferred_element_type=jnp.float32)

    @pl.when(k_idx == pl.num_programs(2) - 1)
    def _():
        o_ref[...] = (acc_ref[...] + b_ref[...].astype(jnp.float32)).astype(o_ref.dtype)


def conv1d(x2d, w, b, *, tm=256, tn=256, tk=256):
    """Equivalent of torch Conv1D.forward on a flattened [M, K] input."""
    M, K = x2d.shape
    N = w.shape[1]
    tm = _pick_tile(M, tm, 8)
    tn = _pick_tile(N, tn, 128)
    tk = _pick_tile(K, tk, 128)
    grid = (M // tm, N // tn, K // tk)
    return pl.pallas_call(
        _linear_kernel,
        out_shape=jax.ShapeDtypeStruct((M, N), x2d.dtype),
        grid=grid,
        in_specs=[
            pl.BlockSpec((tm, tk), lambda i, j, k: (i, k)),
            pl.BlockSpec((tk, tn), lambda i, j, k: (k, j)),
            pl.BlockSpec((1, tn), lambda i, j, k: (0, j)),
        ],
        out_specs=pl.BlockSpec((tm, tn), lambda i, j, k: (i, j)),
        scratch_shapes=[pltpu.VMEM((tm, tn), jnp.float32)],
        compiler_params=pltpu.CompilerParams(
            dimension_semantics=("parallel", "parallel", "arbitrary")),
    )(x2d, w, b.reshape(1, N))


# ----------------------------- flash-style attention -----------------------------

def _flash_attn_kernel(*refs, n_head, head_dim, tq, tk, causal):
    if causal:
        q_ref, k_ref, v_ref, o_ref, m_sc, l_sc, acc_sc = refs
        mask_ref = None
    else:
        q_ref, k_ref, v_ref, mask_ref, o_ref, m_sc, l_sc, acc_sc = refs

    q_idx = pl.program_id(1)
    kv_idx = pl.program_id(2)
    n_kv = pl.num_programs(2)

    @pl.when(kv_idx == 0)
    def _():
        m_sc[...] = jnp.full(m_sc.shape, -jnp.inf, jnp.float32)
        l_sc[...] = jnp.zeros(l_sc.shape, jnp.float32)
        acc_sc[...] = jnp.zeros(acc_sc.shape, jnp.float32)

    def _update():
        q_all = q_ref[0]   # [tq, nx] lane-dense, heads packed along the last dim
        k_all = k_ref[0]   # [tk, nx]
        v_all = v_ref[0]   # [tk, nx]
        scale = jnp.float32(1.0 / math.sqrt(head_dim))

        if causal:
            rows = q_idx * tq + lax.broadcasted_iota(jnp.int32, (tq, tk), 0)
            cols = kv_idx * tk + lax.broadcasted_iota(jnp.int32, (tq, tk), 1)
            keep = rows >= cols
        else:
            keep = mask_ref[...] != 0

        # TODO(synk): group several heads per MXU call (hd << 256) and optionally cast
        # q/k/p to bf16 (f32 accumulation) for higher MXU utilization on v6e/v7x.
        for h in range(n_head):
            lo = h * head_dim
            q_h = q_all[:, lo:lo + head_dim].astype(jnp.float32) * scale
            k_h = k_all[:, lo:lo + head_dim]
            v_h = v_all[:, lo:lo + head_dim]

            # contract last axes directly -> no explicit k transpose / relayout
            s = lax.dot_general(q_h, k_h,
                                dimension_numbers=(((1,), (1,)), ((), ())),
                                preferred_element_type=jnp.float32)
            s = jnp.where(keep, s, jnp.float32(-10000.0))

            m_prev = m_sc[h]                                    # [tq, 1]
            m_new = jnp.maximum(m_prev, jnp.max(s, axis=-1, keepdims=True))
            alpha = jnp.exp(m_prev - m_new)
            p = jnp.exp(s - m_new)                              # [tq, tk]

            l_sc[h] = alpha * l_sc[h] + jnp.sum(p, axis=-1, keepdims=True)
            acc_sc[h] = alpha * acc_sc[h] + jnp.dot(
                p, v_h, preferred_element_type=jnp.float32)
            m_sc[h] = m_new

    if causal:
        # skip KV blocks that lie entirely above the diagonal for this Q block
        needed = kv_idx * tk <= q_idx * tq + (tq - 1)
        pl.when(needed)(_update)
    else:
        _update()

    @pl.when(kv_idx == n_kv - 1)
    def _():
        parts = []
        for h in range(n_head):
            inv_l = pl.reciprocal(l_sc[h], approx=True)
            parts.append(acc_sc[h] * inv_l)
        # single lane-dense [tq, nx] store (heads re-packed along the last dim)
        o_ref[0] = jnp.concatenate(parts, axis=-1).astype(o_ref.dtype)


def flash_attention(q, k, v, mask=None, *, n_head, tq=256, tk=256):
    """q, k, v: [B, T, nx] with heads packed along the last dim.
    mask: [T, T] int (1 = attend) or None for an in-kernel causal mask.
    Returns [B, T, nx]."""
    B, T, nx = q.shape
    hd = nx // n_head
    tq = _pick_tile(T, tq, 8)
    tk = _pick_tile(T, tk, 128)
    grid = (B, T // tq, T // tk)
    causal = mask is None

    kern = functools.partial(_flash_attn_kernel, n_head=n_head, head_dim=hd,
                             tq=tq, tk=tk, causal=causal)

    in_specs = [
        pl.BlockSpec((1, tq, nx), lambda b, i, j: (b, i, 0)),   # q (KV-resident)
        pl.BlockSpec((1, tk, nx), lambda b, i, j: (b, j, 0)),   # k
        pl.BlockSpec((1, tk, nx), lambda b, i, j: (b, j, 0)),   # v
    ]
    args = [q, k, v]
    if not causal:
        in_specs.append(pl.BlockSpec((tq, tk), lambda b, i, j: (i, j)))
        args.append(mask)

    return pl.pallas_call(
        kern,
        out_shape=jax.ShapeDtypeStruct((B, T, nx), q.dtype),
        grid=grid,
        in_specs=in_specs,
        out_specs=pl.BlockSpec((1, tq, nx), lambda b, i, j: (b, i, 0)),
        scratch_shapes=[
            pltpu.VMEM((n_head, tq, 1), jnp.float32),    # running max m
            pltpu.VMEM((n_head, tq, 1), jnp.float32),    # running sum l
            pltpu.VMEM((n_head, tq, hd), jnp.float32),   # output accumulator
        ],
        compiler_params=pltpu.CompilerParams(
            dimension_semantics=("parallel", "parallel", "arbitrary")),
    )(*args)


# ----------------------------- full Attention forward -----------------------------

def attention_forward(x, mask, params, n_head):
    """Replicates Attention.forward (layer_past=None, eval mode).

    x:    [B, T, nx] float32
    mask: [T, T] int32 (1 = keep) or None for an in-kernel causal mask
    returns (a [B, T, nx], present [2, B, H, T, hd])
    """
    B, T, nx = x.shape
    hd = nx // n_head

    # c_attn: [B*T, nx] @ [nx, 3*nx] + b  (tiled, pipelined matmul)
    qkv = conv1d(x.reshape(B * T, nx), params["w_attn"], params["b_attn"])
    qkv = qkv.reshape(B, T, 3 * nx)
    query = qkv[:, :, :nx]
    key = qkv[:, :, nx:2 * nx]
    value = qkv[:, :, 2 * nx:]

    # present = stack((key.transpose(-2,-1), value)) in [2, B, H, T, hd]
    split = lambda t: t.reshape(B, T, n_head, hd).transpose(0, 2, 1, 3)
    present = jnp.stack((split(key), split(value)))

    # flash attention directly on the [B, T, nx] layout (head split/merge fused)
    a = flash_attention(query, key, value, mask, n_head=n_head)   # [B, T, nx]

    # c_proj
    a = conv1d(a.reshape(B * T, nx), params["w_proj"], params["b_proj"]).reshape(B, T, nx)
    # TODO(synk): attn_dropout / resid_dropout are identity here (eval mode); add
    # pltpu.prng_random_bits-based dropout if training-mode semantics are needed.
    return a, present


# ----------------------------- pure-JAX reference -----------------------------

def attention_reference(x, mask, params, n_head):
    B, T, nx = x.shape
    hd = nx // n_head
    qkv = x.reshape(B * T, nx) @ params["w_attn"] + params["b_attn"]
    qkv = qkv.reshape(B, T, 3 * nx)
    query, key, value = jnp.split(qkv, 3, axis=2)
    sh = lambda t: t.reshape(B, T, n_head, hd).transpose(0, 2, 1, 3)
    q, k, v = sh(query), sh(key), sh(value)
    w = jnp.einsum("bhqd,bhkd->bhqk", q, k) / math.sqrt(hd)
    w = jnp.where(mask[None, None] == 0, -10000.0, w)
    w = jax.nn.softmax(w, axis=-1)
    a = jnp.einsum("bhqk,bhkd->bhqd", w, v)
    a = a.transpose(0, 2, 1, 3).reshape(B, T, nx)
    a = a.reshape(B * T, nx) @ params["w_proj"] + params["b_proj"]
    return a.reshape(B, T, nx), jnp.stack((k, v))


# ----------------------------- main -----------------------------

if __name__ == "__main__":
    B, T, nx, n_head = 2, 8, 32, 4

    key = jax.random.PRNGKey(0)
    kx, kwa, kwp = jax.random.split(key, 3)

    x = jax.random.normal(kx, (B, T, nx), dtype=jnp.float32)

    # Conv1D init: weight ~ N(0, 0.02), bias = 0
    params = {
        "w_attn": 0.02 * jax.random.normal(kwa, (nx, 3 * nx), dtype=jnp.float32),
        "b_attn": jnp.zeros((3 * nx,), dtype=jnp.float32),
        "w_proj": 0.02 * jax.random.normal(kwp, (nx, nx), dtype=jnp.float32),
        "b_proj": jnp.zeros((nx,), dtype=jnp.float32),
    }

    # causal mask, 1 = attend
    mask = jnp.tril(jnp.ones((T, T), dtype=jnp.int32))

    # explicit-mask path (faithful to the module signature)
    a, present = attention_forward(x, mask, params, n_head)
    a = jax.block_until_ready(a)
    present = jax.block_until_ready(present)

    # causal fast path (mask generated in-kernel)
    a_causal, present_causal = attention_forward(x, None, params, n_head)
    a_causal = jax.block_until_ready(a_causal)

    a_ref, present_ref = attention_reference(x, mask, params, n_head)
    assert a.shape == (B, T, nx)
    assert present.shape == (2, B, n_head, T, nx // n_head)
    assert jnp.allclose(a, a_ref, atol=1e-3, rtol=1e-3)
    assert jnp.allclose(a_causal, a_ref, atol=1e-3, rtol=1e-3)
    assert jnp.allclose(present, present_ref, atol=1e-5, rtol=1e-5)
    assert jnp.allclose(present_causal, present_ref, atol=1e-5, rtol=1e-5)

    print("KERNEL_OK")
</pallas_src>

<mosaic_0001>
module attributes {stable_mosaic.version = 11 : i64} {
  func.func @_linear_kernel(%arg0: i32, %arg1: i32, %arg2: i32, %arg3: memref<16x32xf32, #tpu.memory_space<vmem>>, %arg4: memref<32x96xf32, #tpu.memory_space<vmem>>, %arg5: memref<1x96xf32, #tpu.memory_space<vmem>>, %arg6: memref<16x96xf32, #tpu.memory_space<vmem>>, %arg7: memref<16x96xf32, #tpu.memory_space<vmem>>) attributes {dimension_semantics = [#tpu.dimension_semantics<parallel>, #tpu.dimension_semantics<parallel>, #tpu.dimension_semantics<arbitrary>], iteration_bounds = array<i64: 1, 1, 1>, scalar_prefetch = 0 : i64, scratch_operands = 1 : i64, tpu.core_type = #tpu.core_type<tc>, window_params = [{transform_indices = @transform_0, window_bounds = array<i64: 16, 32>}, {transform_indices = @transform_1, window_bounds = array<i64: 32, 96>}, {transform_indices = @transform_2, window_bounds = array<i64: 1, 96>}, {transform_indices = @transform_3, window_bounds = array<i64: 16, 96>}]} {
    %c0_i32 = arith.constant 0 : i32
    %0 = arith.cmpi eq, %arg2, %c0_i32 : i32
    %1 = arith.extui %0 : i1 to i32
    %c0_i32_0 = arith.constant 0 : i32
    %2 = arith.cmpi ne, %1, %c0_i32_0 : i32
    scf.if %2 {
      %cst_10 = arith.constant 0.000000e+00 : f32
      %12 = vector.broadcast %cst_10 : f32 to vector<16x96xf32>
      %c0_11 = arith.constant 0 : index
      %c0_12 = arith.constant 0 : index
      %13 = vector.load %arg7[%c0_11, %c0_12] : memref<16x96xf32, #tpu.memory_space<vmem>>, vector<16x96xf32>
      tpu.vector_store %arg7[%c0_11, %c0_12], %12 {strides = array<i32>} : memref<16x96xf32, #tpu.memory_space<vmem>>, vector<16x96xf32>,
    } else {
    }
    %c0 = arith.constant 0 : index
    %c0_1 = arith.constant 0 : index
    %3 = vector.load %arg7[%c0, %c0_1] : memref<16x96xf32, #tpu.memory_space<vmem>>, vector<16x96xf32>
    %c0_2 = arith.constant 0 : index
    %c0_3 = arith.constant 0 : index
    %4 = vector.load %arg3[%c0_2, %c0_3] : memref<16x32xf32, #tpu.memory_space<vmem>>, vector<16x32xf32>
    %c0_4 = arith.constant 0 : index
    %c0_5 = arith.constant 0 : index
    %5 = vector.load %arg4[%c0_4, %c0_5] : memref<32x96xf32, #tpu.memory_space<vmem>>, vector<32x96xf32>
    %cst = arith.constant dense<0.000000e+00> : vector<16x96xf32>
    %6 = tpu.matmul %4, %5, %cst {dimension_numbers = #tpu.dot_dimension_numbers<[1], [0], [0], [1], [0, 0, 1, 1], [], []>} : vector<16x32xf32>, vector<32x96xf32>, vector<16x96xf32> -> vector<16x96xf32>
    %7 = arith.addf %3, %6 : vector<16x96xf32>
    %c0_6 = arith.constant 0 : index
    %c0_7 = arith.constant 0 : index
    %8 = vector.load %arg7[%c0_6, %c0_7] : memref<16x96xf32, #tpu.memory_space<vmem>>, vector<16x96xf32>
    tpu.vector_store %arg7[%c0_6, %c0_7], %7 {strides = array<i32>} : memref<16x96xf32, #tpu.memory_space<vmem>>, vector<16x96xf32>,
    %c0_i32_8 = arith.constant 0 : i32
    %9 = arith.cmpi eq, %arg2, %c0_i32_8 : i32
    %10 = arith.extui %9 : i1 to i32
    %c0_i32_9 = arith.constant 0 : i32
    %11 = arith.cmpi ne, %10, %c0_i32_9 : i32
    scf.if %11 {
      %c0_10 = arith.constant 0 : index
      %c0_11 = arith.constant 0 : index
      %12 = vector.load %arg7[%c0_10, %c0_11] : memref<16x96xf32, #tpu.memory_space<vmem>>, vector<16x96xf32>
      %c0_12 = arith.constant 0 : index
      %c0_13 = arith.constant 0 : index
      %13 = vector.load %arg5[%c0_12, %c0_13] : memref<1x96xf32, #tpu.memory_space<vmem>>, vector<1x96xf32>
      %14 = vector.broadcast %13 : vector<1x96xf32> to vector<16x96xf32>
      %15 = arith.addf %12, %14 : vector<16x96xf32>
      %c0_14 = arith.constant 0 : index
      %c0_15 = arith.constant 0 : index
      %16 = vector.load %arg6[%c0_14, %c0_15] : memref<16x96xf32, #tpu.memory_space<vmem>>, vector<16x96xf32>
      tpu.vector_store %arg6[%c0_14, %c0_15], %15 {strides = array<i32>} : memref<16x96xf32, #tpu.memory_space<vmem>>, vector<16x96xf32>,
    } else {
    }
    return
  }
  func.func @transform_0(%arg0: i32, %arg1: i32, %arg2: i32) -> (i32, i32) {
    %c0_i32 = arith.constant 0 : i32
    return %arg0, %arg2 : i32, i32
  }
  func.func @transform_1(%arg0: i32, %arg1: i32, %arg2: i32) -> (i32, i32) {
    %c0_i32 = arith.constant 0 : i32
    return %arg2, %arg1 : i32, i32
  }
  func.func @transform_2(%arg0: i32, %arg1: i32, %arg2: i32) -> (i32, i32) {
    %c0_i32 = arith.constant 0 : i32
    %c0_i32_0 = arith.constant 0 : i32
    return %c0_i32, %arg1 : i32, i32
  }
  func.func @transform_3(%arg0: i32, %arg1: i32, %arg2: i32) -> (i32, i32) {
    %c0_i32 = arith.constant 0 : i32
    return %arg0, %arg1 : i32, i32
  }
}

</mosaic_0001>

<bundles_post_ra>
// kernel: tpu_custom_call.1
= control target key start
LH: loop header
LB: loop body
LE: loop exit
PB: predicated region body
PF: predicated region fallthrough
CT: control target
= control target key end

     0   :  { %8 = vsyncpa [#allocation4], 0  ;;  %s365_s0 = inlined_call_operand.hbm [shape: f32[16,32], index: 0, kind: input, shape index: {}]   ;;  %s366_s1 = inlined_call_operand.hbm [shape: f32[32,96], index: 1, kind: input, shape index: {}]   ;;  %s367_s2 = inlined_call_operand.vmem [shape: f32[1,96], index: 2, kind: input, shape index: {}]   ;;  %s368_s3 = inlined_call_operand.hbm [shape: f32[16,96], index: 3, kind: output, shape index: {}]  }
   0x1   :  { %9 = vsyncpa [#allocation7], 0 }
   0x2   :  { %10 = vsyncpa [#allocation5], 0  ;;  %s285_s12 = smov [#allocation3]   ;;  %s213_s16 = scalar_lea.hbm %s365_s0, 256 }
   0x3   :  { %s16_s13 = sshll.u32 %s285_s12, 4  ;;  %p214_p0 = scmp.ne.s32.totalorder %s365_s0, %s213_s16  ;;  %s17_s13 = int_to_ptr.vmem [resolvable:$true] %s16_s13 }
   0x4   :  { %p217_p1 = scmp.lt.u32.totalorder %s213_s16, %s365_s0 }
   0x6   :  { %p219_p2 = pnand %p217_p1, %p214_p0 }
   0x8   :  { %222 = shalt.err (!%p219_p2)
}
   0x9   :  { %s223_s21 = scalar_lea.vmem %s17_s13, 256  ;;  %p228_p4 = scmp.lt.s32.totalorder %s17_s13, %s17_s13 }
   0xa   :  { %p224_p3 = scmp.ne.s32.totalorder %s17_s13, %s223_s21  ;;  %p229_p5 = scmp.lt.s32.totalorder %s223_s21, %s223_s21 }
   0xc   :  { %p230_p6 = por %p229_p5, %p228_p4 }
   0xe   :  { %p231_p7 = pnand %p230_p6, %p224_p3 }
  0x10   :  { %234 = shalt.err (!%p231_p7)
}
  0x11   :  { %s286_s22 = smov 128   ;;  %s287_s23 = smov 8  }
  0x12   :  { %22 = dma.hbm_to_vmem [thread:$0]  %s365_s0, 256, %s17_s13, [#allocation4], %s286_s22, %s286_s22, %s287_s23  }
  0x13   :  { %s288_s26 = smov [#allocation6]   ;;  %s235_s30 = scalar_lea.hbm %s366_s1, 512 }
  0x14   :  { %s28_s27 = sshll.u32 %s288_s26, 4  ;;  %p236_p8 = scmp.ne.s32.totalorder %s366_s1, %s235_s30  ;;  %s29_s27 = int_to_ptr.vmem [resolvable:$true] %s28_s27 }
  0x15   :  { %p239_p9 = scmp.lt.u32.totalorder %s235_s30, %s366_s1 }
  0x17   :  { %p241_p10 = pnand %p239_p9, %p236_p8 }
  0x19   :  { %244 = shalt.err (!%p241_p10)
}
  0x1a   :  { %s245_s8 = scalar_lea.vmem %s29_s27, 512  ;;  %p250_p12 = scmp.lt.s32.totalorder %s29_s27, %s29_s27 }
  0x1b   :  { %p246_p11 = scmp.ne.s32.totalorder %s29_s27, %s245_s8  ;;  %p251_p13 = scmp.lt.s32.totalorder %s245_s8, %s245_s8 }
  0x1d   :  { %p252_p0 = por %p251_p13, %p250_p12 }
  0x1f   :  { %p253_p1 = pnand %p252_p0, %p246_p11 }
  0x21   :  { %256 = shalt.err (!%p253_p1)
}
  0x22   :  { %34 = dma.hbm_to_vmem [thread:$0]  %s366_s1, 512, %s29_s27, [#allocation7], %s286_s22, %s286_s22, %s287_s23  }
  0x23   :  { %279 = dma.done.wait [#allocation4], 256  }
  0x24   :  { %280 = vsyncadd [#allocation4], 4294967040 }
  0x25   :  { %281 = dma.done.wait [#allocation7], 512  }
  0x26   :  { %282 = vsyncadd [#allocation7], 4294966784  ;;  %vm47_vm0 = vcmask 785408   ;;  %v289_v0 = vmov 0.0   ;;  %vm58_vm1 = vcmask 261120   ;;  %v54_v1 = vld [vmem:[#allocation6] sm:$0xff] }
  0x27   :  { %49 = vst.msk [vmem:[#allocation2 + $0x8] sm:$0xff] %vm47_vm0, %v289_v0  ;;  %48 = vst.msk [vmem:[#allocation2] sm:$0xff] %vm47_vm0, %v289_v0  ;;  %v55_v2 = vld [vmem:[#allocation6 + $0x8] sm:$0xff]  ;;  %v56_v3 = vld [vmem:[#allocation6 + $0x10] sm:$0xff]  ;;  %s290_s11 = smov [#allocation8]  }
  0x28   :  { %v199_v4 = vpack.c.bf16 %v55_v2, %v54_v1  ;;  %v57_v5 = vld [vmem:[#allocation6 + $0x18] sm:$0xff]  ;;  %v52_v6 = vld [vmem:[#allocation3] sm:$0xff]  ;;  %v181_v15 = vld [vmem:[%s367_s2] ss:$0 sm:$0xff]  ;;  %s166_s12 = sshll.u32 %s290_s11, 4  ;;  %s167_s12 = int_to_ptr.vmem [resolvable:$true] %s166_s12 }
  0x29   :  { %v203_v7 = vpack.c.bf16 %v57_v5, %v56_v3  ;;  %196 = vmatprep.mubr.msk.f32.mxu0 %vm58_vm1, %v52_v6  ;;  %v53_v8 = vld [vmem:[#allocation3 + $0x8] sm:$0xff]  ;;  %s257_s13 = scalar_lea.vmem %s167_s12, 256  ;;  %p262_p3 = scmp.lt.s32.totalorder %s167_s12, %s167_s12 }
  0x2a   :  { %200 = vmatprep.subr.bf16.mxu0 %v199_v4  ;;  %p258_p2 = scmp.ne.s32.totalorder %s167_s12, %s257_s13  ;;  %p263_p4 = scmp.lt.s32.totalorder %s257_s13, %s257_s13 }
  0x2b   :  { %202 = vmatpush3.bf16.msra.mxu0 %v199_v4 }
  0x2c   :  { %204 = vmatprep.subr.bf16.mxu0 %v203_v7  ;;  %p264_p5 = por %p263_p4, %p262_p3 }
  0x2e   :  { %v51_v9 = vld [vmem:[#allocation2 + $0x8] sm:$0xff]  ;;  %v50_v10 = vld [vmem:[#allocation2] sm:$0xff]  ;;  %p265_p6 = pnand %p264_p5, %p258_p2 }
  0x2f   :  { %206 = vmatpush3.bf16.msra.mxu0 %v203_v7 }
  0x32   :  { %197 = vmatmul.mubr.msk.f32.vlgmr.msra.gmra.mrb[0].mxu0 %vm58_vm1, %v53_v8 }
 0x105   :  { %v198_v11 = vpop.f32.mrb[0].mxu0 }
 0x106   :  { %v141_v12 = vadd.f32 %v198_v11, %v51_v9  ;;  %v131_v13 = vpop.f32.mrb[1].mxu0 }
 0x107   :  { %v140_v14 = vadd.f32 %v131_v13, %v50_v10 }
 0x108   :  { %144 = vst.msk [vmem:[#allocation2 + $0x8] sm:$0xff] %vm47_vm0, %v141_v12 }
 0x109   :  { %143 = vst.msk [vmem:[#allocation2] sm:$0xff] %vm47_vm0, %v140_v14 }
 0x10f   :  { %v149_v16 = vld [vmem:[#allocation2 + $0x8] sm:$0xff] }
 0x110   :  { %v148_v17 = vld [vmem:[#allocation2] sm:$0xff]  ;;  %v158_v18 = vadd.f32 %v181_v15, %v149_v16 }
 0x111   :  { %v157_v19 = vadd.f32 %v181_v15, %v148_v17 }
 0x112   :  { %160 = vst.msk [vmem:[#allocation8 + $0x8] sm:$0xff] %vm47_vm0, %v158_v18 }
 0x113   :  { %159 = vst.msk [vmem:[#allocation8] sm:$0xff] %vm47_vm0, %v157_v19 }
 0x114   :  { %268 = shalt.err (!%p265_p6)
}
 0x115   :  { %s269_s15 = scalar_lea.hbm %s368_s3, 256 }
 0x116   :  { %p270_p7 = scmp.ne.s32.totalorder %s368_s3, %s269_s15  ;;  %p273_p8 = scmp.lt.u32.totalorder %s269_s15, %s368_s3 }
 0x118   :  { %p275_p9 = pnand %p273_p8, %p270_p7 }
 0x11a   :  { %278 = shalt.err (!%p275_p9)
}
 0x11b   :  { %172 = dma.vmem_to_hbm [thread:$0]  %s167_s12, 256, %s368_s3, [#allocation5], %s286_s22, %s286_s22, %s287_s23  }
 0x11c   :  { %283 = dma.done.wait [#allocation5], 256  }
 0x11d   :  { %284 = vsyncadd [#allocation5], 4294967040 }
 0x11e   :  { %176 = vsyncpa [#allocation4], 1 }
 0x11f   :  { %177 = vsyncpa [#allocation7], 1 }
 0x120   :  { %178 = vsyncpa [#allocation5], 1 }

</bundles_post_ra>
